<compile_context>
chip_gen: v6e
topology: v6e:2x2x1
jax: 0.10.0
libtpu: 0.0.40
codegen_flags: <defaults>
</compile_context>

<pallas_src>
import functools
import math

import numpy as np
import jax
import jax.numpy as jnp
from jax.experimental import pallas as pl
from jax.experimental.pallas import tpu as pltpu

LN_EPS = 1e-5
NEG_MAX = -float(np.finfo(np.float32).max)   # reference mirrors torch exactly
NEG_BIG = -1e30                              # kernel-side large finite mask value


# ---------------------------------------------------------------------------
# ALiBi helpers (host-side, deterministic glue; static part cached)
# ---------------------------------------------------------------------------
def _get_alibi_slopes(heads):
    def pow2(nh):
        start = 2 ** (-2 ** (-(math.log2(nh) - 3)))
        return [start * start ** i for i in range(nh)]

    if math.log2(heads).is_integer():
        return pow2(heads)
    c = 2 ** math.floor(math.log2(heads))
    return pow2(c) + pow2(2 * c)[0::2][: heads - c]


def _alibi_bias_np(heads, i, j):
    slopes = np.asarray(_get_alibi_slopes(heads), np.float32)
    i_ar = np.arange(j - i, j)
    j_ar = np.arange(j)
    bias = -np.abs(j_ar[None, None, :] - i_ar[None, :, None]).astype(np.float32)
    bias = bias * slopes[:, None, None]                      # (h_alibi, i, j)
    if bias.shape[0] < heads:
        bias = np.concatenate(
            [bias, np.zeros((heads - bias.shape[0], i, j), np.float32)], axis=0)
    return bias


@functools.lru_cache(maxsize=None)
def _static_bias_np(heads, i, j, causal):
    """ALiBi bias with the causal mask baked in as a large finite negative.

    Depends only on static shapes, so it is computed once per configuration
    (the PyTorch module caches the equivalent tensor in a register_buffer).
    """
    bias = np.zeros((heads, i, j), np.float32)
    if causal:
        bias = bias + _alibi_bias_np(heads, i, j)
        causal_mask = np.arange(j)[None, :] > (np.arange(i)[:, None] + (j - i))
        bias = np.where(causal_mask[None], np.float32(NEG_BIG), bias)
    return bias


# ---------------------------------------------------------------------------
# Pallas kernel: one batch element per grid step.
# Fused LayerNorm + lane-dense Q / K|V projections + two-block (null, keys)
# softmax attention + single output-projection matmul.
# ---------------------------------------------------------------------------
def _attention_kernel(x_ref, kv_ref, kpad_ref, bias_k_ref, bias_n_ref,
                      wq_ref, wkv_ref, wout_ref, g_ref, beta_ref,
                      nullk_ref, nullv_ref, o_ref,
                      *, heads, dim_head, num_null_kv, scale):
    cd = wq_ref.dtype                                   # MXU operand dtype (f32/bf16)
    inner = heads * dim_head
    dh = dim_head

    # ---- LayerNorm on this batch element's queries (f32) -------------------
    x = x_ref[0].astype(jnp.float32)                    # (n, dim)
    mu = jnp.mean(x, axis=-1, keepdims=True)
    var = jnp.mean((x - mu) ** 2, axis=-1, keepdims=True)
    xn = (x - mu) * jax.lax.rsqrt(var + LN_EPS) * g_ref[...] + beta_ref[...]

    kv = kv_ref[0].astype(jnp.float32)                  # (nk, dim_ctx)

    # ---- fused, lane-dense projections: one matmul for Q, one for K|V ------
    q2 = jnp.dot(xn.astype(cd), wq_ref[...],
                 preferred_element_type=jnp.float32) * scale        # (n, inner)
    kv2 = jnp.dot(kv.astype(cd), wkv_ref[...],
                  preferred_element_type=jnp.float32)               # (nk, 2*inner)

    # ---- head-major views via static lane slices (register-only) -----------
    qh = jnp.stack([q2[:, h * dh:(h + 1) * dh] for h in range(heads)], axis=0)
    kh = jnp.stack([kv2[:, h * dh:(h + 1) * dh] for h in range(heads)], axis=0)
    vh = jnp.stack([kv2[:, inner + h * dh:inner + (h + 1) * dh]
                    for h in range(heads)], axis=0)                 # (h, nk, dh)

    # ---- attention logits; biases are pre-folded additive f32 tensors ------
    sim_k = jnp.einsum("hid,hjd->hij", qh.astype(cd), kh.astype(cd),
                       preferred_element_type=jnp.float32)
    sim_k = sim_k + bias_k_ref[...] + kpad_ref[...]                 # (h, n, nk)

    if num_null_kv > 0:
        # Null-KV as a separate tiny logits block (no K/V concat, no scratch):
        # two-block softmax over {null columns, real key columns}.
        sim_n = jnp.einsum("hid,hjd->hij", qh.astype(cd),
                           nullk_ref[...].astype(cd),
                           preferred_element_type=jnp.float32)
        sim_n = sim_n + bias_n_ref[...]                             # (h, n, n_null)

        m = jnp.maximum(jnp.max(sim_k, axis=-1, keepdims=True),
                        jnp.max(sim_n, axis=-1, keepdims=True))
        p_k = jnp.exp(sim_k - m)
        p_n = jnp.exp(sim_n - m)
        l = (jnp.sum(p_k, axis=-1, keepdims=True)
             + jnp.sum(p_n, axis=-1, keepdims=True))
        o_h = (jnp.einsum("hij,hjd->hid", p_k.astype(cd), vh.astype(cd),
                          preferred_element_type=jnp.float32)
               + jnp.einsum("hij,hjd->hid", p_n.astype(cd),
                            nullv_ref[...].astype(cd),
                            preferred_element_type=jnp.float32))
    else:
        m = jnp.max(sim_k, axis=-1, keepdims=True)
        p_k = jnp.exp(sim_k - m)
        l = jnp.sum(p_k, axis=-1, keepdims=True)
        o_h = jnp.einsum("hij,hjd->hid", p_k.astype(cd), vh.astype(cd),
                         preferred_element_type=jnp.float32)

    o_h = o_h / l                                                   # (h, n, dh)

    # ---- single output projection: lane-dense (n, inner) operand, K=inner --
    o_flat = jnp.concatenate([o_h[h] for h in range(heads)], axis=-1)   # (n, inner)
    o_ref[0] = jnp.dot(o_flat.astype(cd), wout_ref[...],
                       preferred_element_type=jnp.float32).astype(o_ref.dtype)


# ---------------------------------------------------------------------------
# Parameter init + wrapper
# ---------------------------------------------------------------------------
def init_attention_params(key, dim, dim_context=None, dim_head=64, heads=8,
                          num_null_kv=0):
    dim_context = dim if dim_context is None else dim_context
    inner = dim_head * heads
    k0, k1, k2, k3 = jax.random.split(key, 4)

    def lin(k, fan_in, fan_out):
        bound = 1.0 / math.sqrt(fan_in)
        return jax.random.uniform(k, (fan_in, fan_out), jnp.float32, -bound, bound)

    return {
        "ln_g": jnp.ones((dim,), jnp.float32),
        "ln_b": jnp.zeros((dim,), jnp.float32),
        "ctx_g": jnp.ones((dim_context,), jnp.float32),
        "ctx_b": jnp.zeros((dim_context,), jnp.float32),
        "null_kv": jax.random.normal(k0, (heads, 2 * num_null_kv, dim_head), jnp.float32),
        "w_q": lin(k1, dim, inner),
        "w_kv": lin(k2, dim_context, 2 * inner),
        "w_out": lin(k3, inner, dim),
    }


def _layernorm(x, g, b, eps=LN_EPS):
    mu = jnp.mean(x, axis=-1, keepdims=True)
    var = jnp.mean((x - mu) ** 2, axis=-1, keepdims=True)
    return (x - mu) * jax.lax.rsqrt(var + eps) * g + b


def attention_forward(params, x, mask=None, context=None, attn_bias=None, *,
                      heads, dim_head, causal, num_null_kv, norm_context=True,
                      compute_dtype=jnp.float32):
    # TODO(synk): compute_dtype=jnp.bfloat16 for production on v6e/v7x (f32
    # accumulate kept in-kernel); default stays f32 for tight parity checks.
    b, n, dim = x.shape
    scale = dim_head ** -0.5
    inner = heads * dim_head

    # kv_input = default(context_norm(context), raw x)   (raw x, not self.norm(x))
    if context is not None:
        kv_input = (_layernorm(context, params["ctx_g"], params["ctx_b"])
                    if norm_context else context)
    else:
        kv_input = x
    nk = kv_input.shape[1]
    dim_ctx = kv_input.shape[2]
    j = nk + num_null_kv
    nn_eff = max(num_null_kv, 1)          # dummy size when num_null_kv == 0

    # Pre-folded additive bias: (cached) ALiBi + baked causal mask, plus the
    # optional external attn_bias (left-padded over the null columns).
    bias = jnp.asarray(_static_bias_np(heads, n, j, bool(causal)))
    if attn_bias is not None:
        bias = bias + jnp.pad(attn_bias.astype(jnp.float32),
                              ((0, 0), (0, 0), (num_null_kv, 0)))
    bias_k = bias[:, :, num_null_kv:]                         # (h, n, nk)
    if num_null_kv > 0:
        bias_n = bias[:, :, :num_null_kv]                     # (h, n, num_null_kv)
        null_k = params["null_kv"][:, 0::2, :]                # 'h (n r) d', r=2
        null_v = params["null_kv"][:, 1::2, :]
    else:
        bias_n = jnp.zeros((heads, n, 1), jnp.float32)        # unread dummies
        null_k = jnp.zeros((heads, 1, dim_head), jnp.float32)
        null_v = jnp.zeros((heads, 1, dim_head), jnp.float32)

    # Key-padding mask as an additive bias (0 / NEG_BIG); null columns are
    # never masked, so only the real-key columns are needed.
    if mask is None:
        kpad = jnp.zeros((b, 1, nk), jnp.float32)
    else:
        kpad = jnp.where(mask[:, None, :].astype(bool),
                         0.0, NEG_BIG).astype(jnp.float32)

    w_q = params["w_q"].astype(compute_dtype)
    w_kv = params["w_kv"].astype(compute_dtype)
    w_out = params["w_out"].astype(compute_dtype)
    ln_g2 = params["ln_g"].reshape(1, dim)
    ln_b2 = params["ln_b"].reshape(1, dim)

    kernel = functools.partial(_attention_kernel, heads=heads, dim_head=dim_head,
                               num_null_kv=num_null_kv, scale=scale)

    in_specs = [
        pl.BlockSpec((1, n, dim), lambda i: (i, 0, 0)),               # x
        pl.BlockSpec((1, nk, dim_ctx), lambda i: (i, 0, 0)),          # kv input
        pl.BlockSpec((1, 1, nk), lambda i: (i, 0, 0)),                # key-pad bias
        pl.BlockSpec((heads, n, nk), lambda i: (0, 0, 0)),            # bias (real keys)
        pl.BlockSpec((heads, n, nn_eff), lambda i: (0, 0, 0)),        # bias (null keys)
        pl.BlockSpec((dim, inner), lambda i: (0, 0)),                 # w_q (fused)
        pl.BlockSpec((dim_ctx, 2 * inner), lambda i: (0, 0)),         # w_kv (fused)
        pl.BlockSpec((inner, dim), lambda i: (0, 0)),                 # w_out (fused)
        pl.BlockSpec((1, dim), lambda i: (0, 0)),                     # ln gamma
        pl.BlockSpec((1, dim), lambda i: (0, 0)),                     # ln beta
        pl.BlockSpec((heads, nn_eff, dim_head), lambda i: (0, 0, 0)), # null K
        pl.BlockSpec((heads, nn_eff, dim_head), lambda i: (0, 0, 0)), # null V
    ]
    out_spec = pl.BlockSpec((1, n, dim), lambda i: (i, 0, 0))

    out = pl.pallas_call(
        kernel,
        grid=(b,),
        in_specs=in_specs,
        out_specs=out_spec,
        out_shape=jax.ShapeDtypeStruct((b, n, dim), x.dtype),
        compiler_params=pltpu.CompilerParams(dimension_semantics=("parallel",)),
    )(x, kv_input, kpad, bias_k, bias_n, w_q, w_kv, w_out,
      ln_g2, ln_b2, null_k, null_v)
    return out


# ---------------------------------------------------------------------------
# Pure-JAX reference (mirror of the PyTorch forward) for correctness check
# ---------------------------------------------------------------------------
def attention_reference(params, x, mask=None, context=None, attn_bias=None, *,
                        heads, dim_head, causal, num_null_kv, norm_context=True):
    b, n, dim = x.shape
    scale = dim_head ** -0.5
    inner = heads * dim_head

    if context is not None:
        context = _layernorm(context, params["ctx_g"], params["ctx_b"]) if norm_context else context
    kv_input = context if context is not None else x
    xn = _layernorm(x, params["ln_g"], params["ln_b"])

    q = xn @ params["w_q"]
    k, v = jnp.split(kv_input @ params["w_kv"], 2, axis=-1)

    def to_heads(t):
        return t.reshape(t.shape[0], t.shape[1], heads, dim_head).transpose(0, 2, 1, 3)

    q, k, v = map(to_heads, (q, k, v))
    q = q * scale

    nk = jnp.broadcast_to(params["null_kv"][None, :, 0::2, :], (b, heads, num_null_kv, dim_head))
    nv = jnp.broadcast_to(params["null_kv"][None, :, 1::2, :], (b, heads, num_null_kv, dim_head))
    k = jnp.concatenate([nk, k], axis=-2)
    v = jnp.concatenate([nv, v], axis=-2)

    sim = jnp.einsum("bhid,bhjd->bhij", q, k)
    i, j = sim.shape[-2:]
    if attn_bias is not None:
        sim = sim + jnp.pad(attn_bias, ((0, 0), (0, 0), (num_null_kv, 0)))
    if mask is not None:
        m = jnp.concatenate([jnp.ones((b, num_null_kv), bool), mask.astype(bool)], axis=-1)
        sim = jnp.where(m[:, None, None, :], sim, NEG_MAX)
    if causal:
        sim = sim + jnp.asarray(_alibi_bias_np(heads, i, j))[None]
        ii = jnp.arange(i)[:, None]
        jj = jnp.arange(j)[None, :]
        sim = jnp.where((jj > ii + (j - i))[None, None], NEG_MAX, sim)

    attn = jax.nn.softmax(sim, axis=-1)
    out = jnp.einsum("bhij,bhjd->bhid", attn, v)
    out = out.transpose(0, 2, 1, 3).reshape(b, n, inner)
    return out @ params["w_out"]


# ---------------------------------------------------------------------------
if __name__ == "__main__":
    dim, dim_head, heads, num_null_kv = 32, 16, 4, 2
    batch, seq = 2, 8
    causal = True

    key = jax.random.PRNGKey(0)
    kp, kx, km = jax.random.split(key, 3)
    params = init_attention_params(kp, dim, dim_head=dim_head, heads=heads,
                                   num_null_kv=num_null_kv)
    x = jax.random.normal(kx, (batch, seq, dim), jnp.float32)
    mask = jax.random.uniform(km, (batch, seq)) > 0.25   # key-padding mask (b, j)

    out = attention_forward(params, x, mask=mask, heads=heads, dim_head=dim_head,
                            causal=causal, num_null_kv=num_null_kv)
    out = jax.block_until_ready(out)

    ref = attention_reference(params, x, mask=mask, heads=heads, dim_head=dim_head,
                              causal=causal, num_null_kv=num_null_kv)

    assert out.shape == (batch, seq, dim)
    np.testing.assert_allclose(np.asarray(out), np.asarray(ref), rtol=2e-3, atol=2e-3)
    print("KERNEL_OK")
</pallas_src>

<mosaic_0001>
module attributes {stable_mosaic.version = 11 : i64} {
  func.func @_attention_kernel(%arg0: i32, %arg1: memref<1x8x32xf32, #tpu.memory_space<vmem>>, %arg2: memref<1x8x32xf32, #tpu.memory_space<vmem>>, %arg3: memref<1x1x8xf32, #tpu.memory_space<vmem>>, %arg4: memref<4x8x8xf32, #tpu.memory_space<vmem>>, %arg5: memref<4x8x2xf32, #tpu.memory_space<vmem>>, %arg6: memref<32x64xf32, #tpu.memory_space<vmem>>, %arg7: memref<32x128xf32, #tpu.memory_space<vmem>>, %arg8: memref<64x32xf32, #tpu.memory_space<vmem>>, %arg9: memref<1x32xf32, #tpu.memory_space<vmem>>, %arg10: memref<1x32xf32, #tpu.memory_space<vmem>>, %arg11: memref<4x2x16xf32, #tpu.memory_space<vmem>>, %arg12: memref<4x2x16xf32, #tpu.memory_space<vmem>>, %arg13: memref<1x8x32xf32, #tpu.memory_space<vmem>>) attributes {dimension_semantics = [#tpu.dimension_semantics<parallel>], iteration_bounds = array<i64: 2>, scalar_prefetch = 0 : i64, scratch_operands = 0 : i64, tpu.core_type = #tpu.core_type<tc>, window_params = [{transform_indices = @transform_0, window_bounds = array<i64: 1, 8, 32>}, {transform_indices = @transform_1, window_bounds = array<i64: 1, 8, 32>}, {transform_indices = @transform_2, window_bounds = array<i64: 1, 1, 8>}, {pipeline_mode = #tpu.pipeline_mode<synchronous>, transform_indices = @transform_3, window_bounds = array<i64: 4, 8, 8>}, {pipeline_mode = #tpu.pipeline_mode<synchronous>, transform_indices = @transform_4, window_bounds = array<i64: 4, 8, 2>}, {pipeline_mode = #tpu.pipeline_mode<synchronous>, transform_indices = @transform_5, window_bounds = array<i64: 32, 64>}, {pipeline_mode = #tpu.pipeline_mode<synchronous>, transform_indices = @transform_6, window_bounds = array<i64: 32, 128>}, {pipeline_mode = #tpu.pipeline_mode<synchronous>, transform_indices = @transform_7, window_bounds = array<i64: 64, 32>}, {pipeline_mode = #tpu.pipeline_mode<synchronous>, transform_indices = @transform_8, window_bounds = array<i64: 1, 32>}, {pipeline_mode = #tpu.pipeline_mode<synchronous>, transform_indices = @transform_9, window_bounds = array<i64: 1, 32>}, {pipeline_mode = #tpu.pipeline_mode<synchronous>, transform_indices = @transform_10, window_bounds = array<i64: 4, 2, 16>}, {pipeline_mode = #tpu.pipeline_mode<synchronous>, transform_indices = @transform_11, window_bounds = array<i64: 4, 2, 16>}, {transform_indices = @transform_12, window_bounds = array<i64: 1, 8, 32>}]} {
    %c0 = arith.constant 0 : index
    %c0_0 = arith.constant 0 : index
    %c0_1 = arith.constant 0 : index
    %0 = vector.load %arg1[%c0, %c0_0, %c0_1] : memref<1x8x32xf32, #tpu.memory_space<vmem>>, vector<1x8x32xf32>
    %1 = vector.shape_cast %0 : vector<1x8x32xf32> to vector<8x32xf32>
    %cst = arith.constant dense<0.000000e+00> : vector<8xf32>
    %2 = vector.multi_reduction <add>, %1, %cst [1] : vector<8x32xf32> to vector<8xf32>
    %3 = vector.shape_cast %2 : vector<8xf32> to vector<8x1xf32>
    %cst_2 = arith.constant 3.200000e+01 : f32
    %4 = vector.broadcast %cst_2 : f32 to vector<8x1xf32>
    %5 = arith.divf %3, %4 : vector<8x1xf32>
    %6 = vector.broadcast %5 : vector<8x1xf32> to vector<8x32xf32>
    %7 = arith.subf %1, %6 : vector<8x32xf32>
    %8 = arith.mulf %7, %7 : vector<8x32xf32>
    %cst_3 = arith.constant dense<0.000000e+00> : vector<8xf32>
    %9 = vector.multi_reduction <add>, %8, %cst_3 [1] : vector<8x32xf32> to vector<8xf32>
    %10 = vector.shape_cast %9 : vector<8xf32> to vector<8x1xf32>
    %cst_4 = arith.constant 3.200000e+01 : f32
    %11 = vector.broadcast %cst_4 : f32 to vector<8x1xf32>
    %12 = arith.divf %10, %11 : vector<8x1xf32>
    %13 = vector.broadcast %5 : vector<8x1xf32> to vector<8x32xf32>
    %14 = arith.subf %1, %13 : vector<8x32xf32>
    %cst_5 = arith.constant 9.99999974E-6 : f32
    %15 = vector.broadcast %cst_5 : f32 to vector<8x1xf32>
    %16 = arith.addf %12, %15 : vector<8x1xf32>
    %17 = math.rsqrt %16 : vector<8x1xf32>
    %18 = vector.broadcast %17 : vector<8x1xf32> to vector<8x32xf32>
    %19 = arith.mulf %14, %18 : vector<8x32xf32>
    %c0_6 = arith.constant 0 : index
    %c0_7 = arith.constant 0 : index
    %20 = vector.load %arg9[%c0_6, %c0_7] : memref<1x32xf32, #tpu.memory_space<vmem>>, vector<1x32xf32>
    %21 = vector.broadcast %20 : vector<1x32xf32> to vector<8x32xf32>
    %22 = arith.mulf %19, %21 : vector<8x32xf32>
    %c0_8 = arith.constant 0 : index
    %c0_9 = arith.constant 0 : index
    %23 = vector.load %arg10[%c0_8, %c0_9] : memref<1x32xf32, #tpu.memory_space<vmem>>, vector<1x32xf32>
    %24 = vector.broadcast %23 : vector<1x32xf32> to vector<8x32xf32>
    %25 = arith.addf %22, %24 : vector<8x32xf32>
    %c0_10 = arith.constant 0 : index
    %c0_11 = arith.constant 0 : index
    %c0_12 = arith.constant 0 : index
    %26 = vector.load %arg2[%c0_10, %c0_11, %c0_12] : memref<1x8x32xf32, #tpu.memory_space<vmem>>, vector<1x8x32xf32>
    %27 = vector.shape_cast %26 : vector<1x8x32xf32> to vector<8x32xf32>
    %c0_13 = arith.constant 0 : index
    %c0_14 = arith.constant 0 : index
    %28 = vector.load %arg6[%c0_13, %c0_14] : memref<32x64xf32, #tpu.memory_space<vmem>>, vector<32x64xf32>
    %cst_15 = arith.constant dense<0.000000e+00> : vector<8x64xf32>
    %29 = tpu.matmul %25, %28, %cst_15 {dimension_numbers = #tpu.dot_dimension_numbers<[1], [0], [0], [1], [0, 0, 1, 1], [], []>} : vector<8x32xf32>, vector<32x64xf32>, vector<8x64xf32> -> vector<8x64xf32>
    %cst_16 = arith.constant 2.500000e-01 : f32
    %30 = vector.broadcast %cst_16 : f32 to vector<8x64xf32>
    %31 = arith.mulf %29, %30 : vector<8x64xf32>
    %c0_17 = arith.constant 0 : index
    %c0_18 = arith.constant 0 : index
    %32 = vector.load %arg7[%c0_17, %c0_18] : memref<32x128xf32, #tpu.memory_space<vmem>>, vector<32x128xf32>
    %cst_19 = arith.constant dense<0.000000e+00> : vector<8x128xf32>
    %33 = tpu.matmul %27, %32, %cst_19 {dimension_numbers = #tpu.dot_dimension_numbers<[1], [0], [0], [1], [0, 0, 1, 1], [], []>} : vector<8x32xf32>, vector<32x128xf32>, vector<8x128xf32> -> vector<8x128xf32>
    %34 = vector.extract_strided_slice %31 {offsets = [0, 0], sizes = [8, 16], strides = [1, 1]} : vector<8x64xf32> to vector<8x16xf32>
    %35 = vector.extract_strided_slice %31 {offsets = [0, 16], sizes = [8, 16], strides = [1, 1]} : vector<8x64xf32> to vector<8x16xf32>
    %36 = vector.extract_strided_slice %31 {offsets = [0, 32], sizes = [8, 16], strides = [1, 1]} : vector<8x64xf32> to vector<8x16xf32>
    %37 = vector.extract_strided_slice %31 {offsets = [0, 48], sizes = [8, 16], strides = [1, 1]} : vector<8x64xf32> to vector<8x16xf32>
    %38 = vector.shape_cast %34 : vector<8x16xf32> to vector<1x8x16xf32>
    %39 = vector.shape_cast %35 : vector<8x16xf32> to vector<1x8x16xf32>
    %40 = vector.shape_cast %36 : vector<8x16xf32> to vector<1x8x16xf32>
    %41 = vector.shape_cast %37 : vector<8x16xf32> to vector<1x8x16xf32>
    %42 = tpu.concatenate %38, %39, %40, %41 in 0 : vector<1x8x16xf32>, vector<1x8x16xf32>, vector<1x8x16xf32>, vector<1x8x16xf32> -> vector<4x8x16xf32>
    %43 = vector.extract_strided_slice %33 {offsets = [0, 0], sizes = [8, 16], strides = [1, 1]} : vector<8x128xf32> to vector<8x16xf32>
    %44 = vector.extract_strided_slice %33 {offsets = [0, 16], sizes = [8, 16], strides = [1, 1]} : vector<8x128xf32> to vector<8x16xf32>
    %45 = vector.extract_strided_slice %33 {offsets = [0, 32], sizes = [8, 16], strides = [1, 1]} : vector<8x128xf32> to vector<8x16xf32>
    %46 = vector.extract_strided_slice %33 {offsets = [0, 48], sizes = [8, 16], strides = [1, 1]} : vector<8x128xf32> to vector<8x16xf32>
    %47 = vector.shape_cast %43 : vector<8x16xf32> to vector<1x8x16xf32>
    %48 = vector.shape_cast %44 : vector<8x16xf32> to vector<1x8x16xf32>
    %49 = vector.shape_cast %45 : vector<8x16xf32> to vector<1x8x16xf32>
    %50 = vector.shape_cast %46 : vector<8x16xf32> to vector<1x8x16xf32>
    %51 = tpu.concatenate %47, %48, %49, %50 in 0 : vector<1x8x16xf32>, vector<1x8x16xf32>, vector<1x8x16xf32>, vector<1x8x16xf32> -> vector<4x8x16xf32>
    %52 = vector.extract_strided_slice %33 {offsets = [0, 64], sizes = [8, 16], strides = [1, 1]} : vector<8x128xf32> to vector<8x16xf32>
    %53 = vector.extract_strided_slice %33 {offsets = [0, 80], sizes = [8, 16], strides = [1, 1]} : vector<8x128xf32> to vector<8x16xf32>
    %54 = vector.extract_strided_slice %33 {offsets = [0, 96], sizes = [8, 16], strides = [1, 1]} : vector<8x128xf32> to vector<8x16xf32>
    %55 = vector.extract_strided_slice %33 {offsets = [0, 112], sizes = [8, 16], strides = [1, 1]} : vector<8x128xf32> to vector<8x16xf32>
    %56 = vector.shape_cast %52 : vector<8x16xf32> to vector<1x8x16xf32>
    %57 = vector.shape_cast %53 : vector<8x16xf32> to vector<1x8x16xf32>
    %58 = vector.shape_cast %54 : vector<8x16xf32> to vector<1x8x16xf32>
    %59 = vector.shape_cast %55 : vector<8x16xf32> to vector<1x8x16xf32>
    %60 = tpu.concatenate %56, %57, %58, %59 in 0 : vector<1x8x16xf32>, vector<1x8x16xf32>, vector<1x8x16xf32>, vector<1x8x16xf32> -> vector<4x8x16xf32>
    "tpu.trace_start"() <{level = 10 : i32, message = "hid,hjd->hij"}> : () -> ()
    %cst_20 = arith.constant dense<0.000000e+00> : vector<4x8x8xf32>
    %61 = tpu.matmul %42, %51, %cst_20 {dimension_numbers = #tpu.dot_dimension_numbers<[2], [2], [1], [1], [0, 0, 0, 1, 1, 1], [0], [0]>} : vector<4x8x16xf32>, vector<4x8x16xf32>, vector<4x8x8xf32> -> vector<4x8x8xf32>
    "tpu.trace_stop"() : () -> ()
    %c0_21 = arith.constant 0 : index
    %c0_22 = arith.constant 0 : index
    %c0_23 = arith.constant 0 : index
    %62 = vector.load %arg4[%c0_21, %c0_22, %c0_23] : memref<4x8x8xf32, #tpu.memory_space<vmem>>, vector<4x8x8xf32>
    %63 = arith.addf %61, %62 : vector<4x8x8xf32>
    %c0_24 = arith.constant 0 : index
    %c0_25 = arith.constant 0 : index
    %c0_26 = arith.constant 0 : index
    %64 = vector.load %arg3[%c0_24, %c0_25, %c0_26] : memref<1x1x8xf32, #tpu.memory_space<vmem>>, vector<1x1x8xf32>
    %65 = vector.broadcast %64 : vector<1x1x8xf32> to vector<4x8x8xf32>
    %66 = arith.addf %63, %65 : vector<4x8x8xf32>
    %c0_27 = arith.constant 0 : index
    %c0_28 = arith.constant 0 : index
    %c0_29 = arith.constant 0 : index
    %67 = vector.load %arg11[%c0_27, %c0_28, %c0_29] : memref<4x2x16xf32, #tpu.memory_space<vmem>>, vector<4x2x16xf32>
    "tpu.trace_start"() <{level = 10 : i32, message = "hid,hjd->hij"}> : () -> ()
    %cst_30 = arith.constant dense<0.000000e+00> : vector<4x8x2xf32>
    %68 = tpu.matmul %42, %67, %cst_30 {dimension_numbers = #tpu.dot_dimension_numbers<[2], [2], [1], [1], [0, 0, 0, 1, 1, 1], [0], [0]>} : vector<4x8x16xf32>, vector<4x2x16xf32>, vector<4x8x2xf32> -> vector<4x8x2xf32>
    "tpu.trace_stop"() : () -> ()
    %c0_31 = arith.constant 0 : index
    %c0_32 = arith.constant 0 : index
    %c0_33 = arith.constant 0 : index
    %69 = vector.load %arg5[%c0_31, %c0_32, %c0_33] : memref<4x8x2xf32, #tpu.memory_space<vmem>>, vector<4x8x2xf32>
    %70 = arith.addf %68, %69 : vector<4x8x2xf32>
    %cst_34 = arith.constant dense<0xFF800000> : vector<4x8xf32>
    %71 = vector.multi_reduction <maximumf>, %66, %cst_34 [2] : vector<4x8x8xf32> to vector<4x8xf32>
    %72 = vector.shape_cast %71 : vector<4x8xf32> to vector<4x8x1xf32>
    %cst_35 = arith.constant dense<0xFF800000> : vector<4x8xf32>
    %73 = vector.multi_reduction <maximumf>, %70, %cst_35 [2] : vector<4x8x2xf32> to vector<4x8xf32>
    %74 = vector.shape_cast %73 : vector<4x8xf32> to vector<4x8x1xf32>
    %75 = arith.maximumf %72, %74 : vector<4x8x1xf32>
    %76 = vector.broadcast %75 : vector<4x8x1xf32> to vector<4x8x8xf32>
    %77 = arith.subf %66, %76 : vector<4x8x8xf32>
    %78 = math.exp %77 : vector<4x8x8xf32>
    %79 = vector.broadcast %75 : vector<4x8x1xf32> to vector<4x8x2xf32>
    %80 = arith.subf %70, %79 : vector<4x8x2xf32>
    %81 = math.exp %80 : vector<4x8x2xf32>
    %cst_36 = arith.constant dense<0.000000e+00> : vector<4x8xf32>
    %82 = vector.multi_reduction <add>, %78, %cst_36 [2] : vector<4x8x8xf32> to vector<4x8xf32>
    %83 = vector.shape_cast %82 : vector<4x8xf32> to vector<4x8x1xf32>
    %cst_37 = arith.constant dense<0.000000e+00> : vector<4x8xf32>
    %84 = vector.multi_reduction <add>, %81, %cst_37 [2] : vector<4x8x2xf32> to vector<4x8xf32>
    %85 = vector.shape_cast %84 : vector<4x8xf32> to vector<4x8x1xf32>
    %86 = arith.addf %83, %85 : vector<4x8x1xf32>
    "tpu.trace_start"() <{level = 10 : i32, message = "hij,hjd->hid"}> : () -> ()
    %cst_38 = arith.constant dense<0.000000e+00> : vector<4x8x16xf32>
    %87 = tpu.matmul %78, %60, %cst_38 {dimension_numbers = #tpu.dot_dimension_numbers<[2], [1], [1], [2], [0, 0, 0, 1, 1, 2], [0], [0]>} : vector<4x8x8xf32>, vector<4x8x16xf32>, vector<4x8x16xf32> -> vector<4x8x16xf32>
    "tpu.trace_stop"() : () -> ()
    %c0_39 = arith.constant 0 : index
    %c0_40 = arith.constant 0 : index
    %c0_41 = arith.constant 0 : index
    %88 = vector.load %arg12[%c0_39, %c0_40, %c0_41] : memref<4x2x16xf32, #tpu.memory_space<vmem>>, vector<4x2x16xf32>
    "tpu.trace_start"() <{level = 10 : i32, message = "hij,hjd->hid"}> : () -> ()
    %cst_42 = arith.constant dense<0.000000e+00> : vector<4x8x16xf32>
    %89 = tpu.matmul %81, %88, %cst_42 {dimension_numbers = #tpu.dot_dimension_numbers<[2], [1], [1], [2], [0, 0, 0, 1, 1, 2], [0], [0]>} : vector<4x8x2xf32>, vector<4x2x16xf32>, vector<4x8x16xf32> -> vector<4x8x16xf32>
    "tpu.trace_stop"() : () -> ()
    %90 = arith.addf %87, %89 : vector<4x8x16xf32>
    %91 = vector.broadcast %86 : vector<4x8x1xf32> to vector<4x8x16xf32>
    %92 = arith.divf %90, %91 : vector<4x8x16xf32>
    %93 = vector.extract_strided_slice %92 {offsets = [0, 0, 0], sizes = [1, 8, 16], strides = [1, 1, 1]} : vector<4x8x16xf32> to vector<1x8x16xf32>
    %94 = vector.shape_cast %93 : vector<1x8x16xf32> to vector<8x16xf32>
    %95 = vector.extract_strided_slice %92 {offsets = [1, 0, 0], sizes = [1, 8, 16], strides = [1, 1, 1]} : vector<4x8x16xf32> to vector<1x8x16xf32>
    %96 = vector.shape_cast %95 : vector<1x8x16xf32> to vector<8x16xf32>
    %97 = vector.extract_strided_slice %92 {offsets = [2, 0, 0], sizes = [1, 8, 16], strides = [1, 1, 1]} : vector<4x8x16xf32> to vector<1x8x16xf32>
    %98 = vector.shape_cast %97 : vector<1x8x16xf32> to vector<8x16xf32>
    %99 = vector.extract_strided_slice %92 {offsets = [3, 0, 0], sizes = [1, 8, 16], strides = [1, 1, 1]} : vector<4x8x16xf32> to vector<1x8x16xf32>
    %100 = vector.shape_cast %99 : vector<1x8x16xf32> to vector<8x16xf32>
    %101 = tpu.concatenate %94, %96, %98, %100 in 1 : vector<8x16xf32>, vector<8x16xf32>, vector<8x16xf32>, vector<8x16xf32> -> vector<8x64xf32>
    %c0_43 = arith.constant 0 : index
    %c0_44 = arith.constant 0 : index
    %102 = vector.load %arg8[%c0_43, %c0_44] : memref<64x32xf32, #tpu.memory_space<vmem>>, vector<64x32xf32>
    %cst_45 = arith.constant dense<0.000000e+00> : vector<8x32xf32>
    %103 = tpu.matmul %101, %102, %cst_45 {dimension_numbers = #tpu.dot_dimension_numbers<[1], [0], [0], [1], [0, 0, 1, 1], [], []>} : vector<8x64xf32>, vector<64x32xf32>, vector<8x32xf32> -> vector<8x32xf32>
    %c0_46 = arith.constant 0 : index
    %c0_47 = arith.constant 0 : index
    %c0_48 = arith.constant 0 : index
    %104 = vector.load %arg13[%c0_46, %c0_47, %c0_48] : memref<1x8x32xf32, #tpu.memory_space<vmem>>, vector<1x8x32xf32>
    %105 = vector.shape_cast %104 : vector<1x8x32xf32> to vector<8x32xf32>
    %106 = vector.shape_cast %103 : vector<8x32xf32> to vector<1x8x32xf32>
    tpu.vector_store %arg13[%c0_46, %c0_47, %c0_48], %106 {strides = array<i32>} : memref<1x8x32xf32, #tpu.memory_space<vmem>>, vector<1x8x32xf32>,
    return
  }
  func.func @transform_0(%arg0: i32) -> (i32, i32, i32) {
    %c0_i32 = arith.constant 0 : i32
    %c0_i32_0 = arith.constant 0 : i32
    %c0_i32_1 = arith.constant 0 : i32
    return %arg0, %c0_i32, %c0_i32_0 : i32, i32, i32
  }
  func.func @transform_1(%arg0: i32) -> (i32, i32, i32) {
    %c0_i32 = arith.constant 0 : i32
    %c0_i32_0 = arith.constant 0 : i32
    %c0_i32_1 = arith.constant 0 : i32
    return %arg0, %c0_i32, %c0_i32_0 : i32, i32, i32
  }
  func.func @transform_2(%arg0: i32) -> (i32, i32, i32) {
    %c0_i32 = arith.constant 0 : i32
    %c0_i32_0 = arith.constant 0 : i32
    %c0_i32_1 = arith.constant 0 : i32
    return %arg0, %c0_i32, %c0_i32_0 : i32, i32, i32
  }
  func.func @transform_3(%arg0: i32) -> (i32, i32, i32) {
    %c0_i32 = arith.constant 0 : i32
    %c0_i32_0 = arith.constant 0 : i32
    %c0_i32_1 = arith.constant 0 : i32
    %c0_i32_2 = arith.constant 0 : i32
    return %c0_i32, %c0_i32_0, %c0_i32_1 : i32, i32, i32
  }
  func.func @transform_4(%arg0: i32) -> (i32, i32, i32) {
    %c0_i32 = arith.constant 0 : i32
    %c0_i32_0 = arith.constant 0 : i32
    %c0_i32_1 = arith.constant 0 : i32
    %c0_i32_2 = arith.constant 0 : i32
    return %c0_i32, %c0_i32_0, %c0_i32_1 : i32, i32, i32
  }
  func.func @transform_5(%arg0: i32) -> (i32, i32) {
    %c0_i32 = arith.constant 0 : i32
    %c0_i32_0 = arith.constant 0 : i32
    %c0_i32_1 = arith.constant 0 : i32
    return %c0_i32, %c0_i32_0 : i32, i32
  }
  func.func @transform_6(%arg0: i32) -> (i32, i32) {
    %c0_i32 = arith.constant 0 : i32
    %c0_i32_0 = arith.constant 0 : i32
    %c0_i32_1 = arith.constant 0 : i32
    return %c0_i32, %c0_i32_0 : i32, i32
  }
  func.func @transform_7(%arg0: i32) -> (i32, i32) {
    %c0_i32 = arith.constant 0 : i32
    %c0_i32_0 = arith.constant 0 : i32
    %c0_i32_1 = arith.constant 0 : i32
    return %c0_i32, %c0_i32_0 : i32, i32
  }
  func.func @transform_8(%arg0: i32) -> (i32, i32) {
    %c0_i32 = arith.constant 0 : i32
    %c0_i32_0 = arith.constant 0 : i32
    %c0_i32_1 = arith.constant 0 : i32
    return %c0_i32, %c0_i32_0 : i32, i32
  }
  func.func @transform_9(%arg0: i32) -> (i32, i32) {
    %c0_i32 = arith.constant 0 : i32
    %c0_i32_0 = arith.constant 0 : i32
    %c0_i32_1 = arith.constant 0 : i32
    return %c0_i32, %c0_i32_0 : i32, i32
  }
  func.func @transform_10(%arg0: i32) -> (i32, i32, i32) {
    %c0_i32 = arith.constant 0 : i32
    %c0_i32_0 = arith.constant 0 : i32
    %c0_i32_1 = arith.constant 0 : i32
    %c0_i32_2 = arith.constant 0 : i32
    return %c0_i32, %c0_i32_0, %c0_i32_1 : i32, i32, i32
  }
  func.func @transform_11(%arg0: i32) -> (i32, i32, i32) {
    %c0_i32 = arith.constant 0 : i32
    %c0_i32_0 = arith.constant 0 : i32
    %c0_i32_1 = arith.constant 0 : i32
    %c0_i32_2 = arith.constant 0 : i32
    return %c0_i32, %c0_i32_0, %c0_i32_1 : i32, i32, i32
  }
  func.func @transform_12(%arg0: i32) -> (i32, i32, i32) {
    %c0_i32 = arith.constant 0 : i32
    %c0_i32_0 = arith.constant 0 : i32
    %c0_i32_1 = arith.constant 0 : i32
    return %arg0, %c0_i32, %c0_i32_0 : i32, i32, i32
  }
}

</mosaic_0001>

<bundles_post_ra>
// kernel: tpu_custom_call.1
= control target key start
LH: loop header
LB: loop body
LE: loop exit
PB: predicated region body
PF: predicated region fallthrough
CT: control target
= control target key end

     0   :  { %s3412_s0 = inlined_call_operand.vmem [shape: f32[2,8,32], index: 0, kind: input, shape index: {}]   ;;  %s3413_s1 = inlined_call_operand.hbm [shape: f32[2,8,32], index: 1, kind: input, shape index: {}]   ;;  %s3414_s2 = inlined_call_operand.hbm [shape: f32[2,1,8], index: 2, kind: input, shape index: {}]   ;;  %s3415_s3 = inlined_call_operand.vmem [shape: f32[4,8,8], index: 3, kind: input, shape index: {}]   ;;  %s3416_s4 = inlined_call_operand.vmem [shape: f32[4,8,2], index: 4, kind: input, shape index: {}]   ;;  %s3417_s5 = inlined_call_operand.vmem [shape: f32[32,64], index: 5, kind: input, shape index: {}]   ;;  %s3418_s6 = inlined_call_operand.vmem [shape: f32[32,128], index: 6, kind: input, shape index: {}]   ;;  %s3419_s7 = inlined_call_operand.vmem [shape: f32[64,32], index: 7, kind: input, shape index: {}]   ;;  %s3420_s8 = inlined_call_operand.hbm [shape: f32[1,32], index: 8, kind: input, shape index: {}]   ;;  %s3421_s9 = inlined_call_operand.hbm [shape: f32[1,32], index: 9, kind: input, shape index: {}]   ;;  %s3422_s10 = inlined_call_operand.vmem [shape: f32[4,2,16], index: 10, kind: input, shape index: {}]   ;;  %s3423_s11 = inlined_call_operand.hbm [shape: f32[4,2,16], index: 11, kind: input, shape index: {}]   ;;  %s3424_s12 = inlined_call_operand.hbm [shape: f32[2,8,32], index: 12, kind: output, shape index: {}]  }
   0x1   :  { %3433 = sst [smem:[#allocation21_spill]] %s3420_s8 }
   0x2   :  { %3434 = sst [smem:[#allocation22_spill]] %s3421_s9 }
   0x3   :  { %3435 = sst [smem:[#allocation23_spill]] %s3423_s11 }
   0x4   :  { %17 = vsyncpa [#allocation3], 0 }
   0x5   :  { %19 = vsyncpa [#allocation3 + $0x1], 0 }
   0x6   :  { %20 = vsyncpa [#allocation6], 0 }
   0x7   :  { %22 = vsyncpa [#allocation6 + $0x1], 0 }
   0x8   :  { %23 = vsyncpa [#allocation9], 0 }
   0x9   :  { %24 = vsyncpa [#allocation4], 0 }
   0xa   :  { %26 = vsyncpa [#allocation4 + $0x1], 0  ;;  %s2918_s21 = smov 0   ;;  %s2920_s22 = smov 0  }
   0xb   :  { %s2922_s23 = smov 0   ;;  %s2924_s24 = smov 0  }
   0xc LB: > { %3436 = sst [smem:[#allocation17_spill]] %s2830_s23  ;;  %s2939_s25 = sadd.s32 4294967295, %s2834_s24   ;;  %s2834_s24 = sphi %s2924_s24, %s3461_s24   ;;  %s2830_s23 = sphi %s2922_s23, %s3463_s23   ;;  %s2826_s22 = sphi %s2920_s22, %s3465_s22   ;;  %s2822_s21 = sphi %s2918_s21, %s3464_s21  }
   0xd   : > { %s2279_s26 = sadd.s32 4294967294, %s2834_s24   ;;  %p78_p0 = scmp.ne.s32.totalorder %s2826_s22, %s2822_s21 }
   0xe   : > { %p3425_p1 = scmp.eq.s32.totalorder %s2939_s25, 0  ;;  %p323_p3 = scmp.eq.s32.totalorder %s2279_s26, 1 }
   0xf   : > { %p2280_p5 = scmp.ge.s32.totalorder %s2834_s24, 1  ;;  %p330_p7 = scmp.lt.s32.totalorder %s2834_s24, 3 }
  0x10   : > { %p2948_p4 = por %p3425_p1, %p78_p0  ;;  %p2953_p6 = por %p323_p3, %p78_p0 }
  0x11   : > { %p2958_p8 = pnand %p2280_p5, %p330_p7  ;;  %s2836_s30 = smov [#allocation7]  }
  0x12   : > { %s3437_s27 = scalar_select %p2948_p4, 1, 0 }
  0x13   : > { %s3438_s28 = scalar_select %p2953_p6, 1, 0 }
  0x14   : > { %s3440_s29 = scalar_select %p2958_p8, 1, 0 }
  0x15   : > { %3439 = sst [smem:[#allocation18_spill]] %s3438_s28  ;;  %s358_s13 = sshll.u32 %s2836_s30, 4  ;;  %s359_s13 = int_to_ptr.vmem [resolvable:$true] %s358_s13 }
  0x16   : > { %p2523_p10 = pneg %p2958_p8  ;;  %s2837_s14 = smov [#allocation8]  }
  0x17   : > { %s369_s15 = sshll.u32 %s2837_s14, 4  ;;  %s2838_s17 = smov [#allocation10]   ;;  %s370_s15 = int_to_ptr.vmem [resolvable:$true] %s369_s15 }
  0x18   : > { %p2967_p11 = pnand %p2523_p10, %p3425_p1  ;;  %s382_s18 = sshll.u32 %s2838_s17, 4  ;;  %s2971_s18 = int_to_ptr.vmem [resolvable:$true] %s382_s18 }
  0x19   : > { %s2635_s19 = scalar_lea.vmem %s359_s13, 16  ;;  %s2642_s20 = scalar_lea.vmem %s359_s13, 32 }
  0x1a   : > { %p2626_p12 = pneg %p2967_p11  ;;  %p2636_p13 = scmp.ne.s32.totalorder %s359_s13, %s2635_s19 }
  0x1b   : > { %p2643_p5 = scmp.lt.s32.totalorder %s359_s13, %s359_s13  ;;  %p2644_p7 = scmp.lt.s32.totalorder %s2642_s20, %s2635_s19 }
  0x1c   : > { %p2638_p0 = pnand %p2636_p13, %p2626_p12 }
  0x1d   : > { %p2645_p10 = por %p2644_p7, %p2643_p5 }
  0x1e   : > { %p2639_p3 = pneg %p2638_p0 }
  0x20   : > { %p2646_p9 = pnand %p2645_p10, %p2639_p3 }
  0x22   : > { %2649 = shalt.err (!%p2646_p9)
}
  0x23   : > { %s3442_s8 = sld [smem:[#allocation21_spill]]  ;;  %s2661_s14 = scalar_lea.vmem %s370_s15, 16 }
  0x24   : > { %p2662_p1 = scmp.ne.s32.totalorder %s370_s15, %s2661_s14  ;;  %s2668_s17 = scalar_lea.vmem %s370_s15, 32 }
  0x25   : > { %p2669_p0 = scmp.lt.s32.totalorder %s370_s15, %s370_s15  ;;  %p2670_p6 = scmp.lt.s32.totalorder %s2668_s17, %s2661_s14 }
  0x26   : > { %p2664_p2 = pnand %p2662_p1, %p2626_p12 }
  0x27   : > { %p2671_p4 = por %p2670_p6, %p2669_p0 }
  0x28   : > { %p2665_p13 = pneg %p2664_p2 }
  0x29   : > { %2526 = dma.hbm_to_vmem [thread:$0]  (!%p2967_p11), %s3442_s8, 16, %s359_s13, [#allocation6]  }
  0x2a   : > { %p2672_p5 = pnand %p2671_p4, %p2665_p13 }
  0x2c   : > { %2675 = shalt.err (!%p2672_p5)
}
  0x2d   : > { %s3443_s9 = sld [smem:[#allocation22_spill]]  ;;  %s2687_s13 = scalar_lea.vmem %s2971_s18, 128 }
  0x2e   : > { %p2688_p9 = scmp.ne.s32.totalorder %s2971_s18, %s2687_s13  ;;  %p2695_p6 = scmp.lt.s32.totalorder %s2971_s18, %s2971_s18 }
  0x2f   : > { %p2696_p4 = scmp.lt.s32.totalorder %s2687_s13, %s2687_s13 }
  0x30   : > { %p2690_p1 = pnand %p2688_p9, %p2626_p12 }
  0x31   : > { %p2697_p3 = por %p2696_p4, %p2695_p6 }
  0x32   : > { %p2691_p2 = pneg %p2690_p1 }
  0x33   : > { %2529 = dma.hbm_to_vmem [thread:$0]  (!%p2967_p11), %s3443_s9, 16, %s370_s15, [#allocation9]  }
  0x34   : > { %p2698_p7 = pnand %p2697_p3, %p2691_p2 }
  0x36   : > { %2701 = shalt.err (!%p2698_p7)
}
  0x37   : > { %s2839_s26 = smov 32   ;;  %s2840_s15 = smov 2  }
  0x38   : > { %s3444_s11 = sld [smem:[#allocation23_spill]]  ;;  %s3005_s17 = sadd.s32 1, %s2834_s24  }
  0x39   : > { %3445 = sst [smem:[#allocation19_spill]] %s3005_s17  ;;  %s62_s19 = ssub.s32 %s2834_s24, %s3005_s17 }
  0x3a   : > { %s65_s20 = sadd.s32 1, %s2830_s23  ;;  %p63_p12 = scmp.eq.s32.totalorder %s62_s19, 0 }
  0x3b   : > { %p72_p10 = scmp.ne.s32.totalorder %s2830_s23, %s2826_s22  ;;  %p73_p13 = scmp.eq.s32.totalorder %s2834_s24, 0 }
  0x3c   : > { %p2547_p0 = scmp.lt.s32.totalorder %s2834_s24, 2  ;;  %p3447_p9 = scmp.eq.s32.totalorder %s2939_s25, 1 }
  0x3d   : > { %s3015_s13 = scalar_select %p63_p12, %s2830_s23, %s65_s20  }
  0x3e   : > { %2532 = dma.hbm_to_vmem [thread:$0]  (!%p2967_p11), %s3444_s11, 128, %s2971_s18, [#allocation9], %s2839_s26, %s2839_s26, %s2840_s15  }
  0x3f   : > { %3446 = sst [smem:[#allocation20_spill]] %s3015_s13  ;;  %p74_p5 = por %p73_p13, %p72_p10 }
  0x40   : > { %p3019_p1 = por %p3447_p9, %p72_p10  ;;  %s3024_s30 = sand.u32 1, %s2830_s23  }
  0x41   : > { %s2286_s18 = sshll.u32 %s2834_s24, 7  ;;  %s2285_s26 = sshll.u32 %s3024_s30, 3 }
  0x42   : > { %s3448_s16 = scalar_select %p3019_p1, 1, 0 }
  0x43   : > { %s3031_s19 = scalar_lea.hbm %s3413_s1, %s2286_s18  ;;  %s407_s20 = scalar_lea.vmem [#allocation2], %s2285_s26 }
  0x44   : > { %s414_s8 = sshll.u32 %s407_s20, 4  ;;  %p3033_p11 = pnand %p2547_p0, %p74_p5  ;;  %s415_s8 = int_to_ptr.vmem [resolvable:$true] %s414_s8 }
  0x45   : > { %s404_s13 = scalar_lea.sflag [#allocation3], %s3024_s30  ;;  %s2702_s23 = scalar_lea.hbm %s3031_s19, 128 }
  0x46   : > { %p2703_p2 = scmp.ne.s32.totalorder %s3031_s19, %s2702_s23  ;;  %p2704_p6 = pneg %p3033_p11 }
  0x47   : > { %s2707_s15 = scalar_lea.hbm %s3413_s1, 256  ;;  %p2708_p7 = scmp.lt.s32.totalorder %s3031_s19, %s3413_s1 }
  0x48   : > { %p2705_p4 = pnand %p2704_p6, %p2703_p2  ;;  %p2709_p12 = scmp.lt.s32.totalorder %s2707_s15, %s2702_s23 }
  0x4a   : > { %p2706_p3 = pneg %p2705_p4  ;;  %p2710_p10 = por %p2709_p12, %p2708_p7 }
  0x4c   : > { %p2711_p13 = pnand %p2710_p10, %p2706_p3 }
  0x4e   : > { %2714 = shalt.err (!%p2711_p13)
}
  0x4f   : > { %s2715_s11 = scalar_lea.vmem %s415_s8, 128  ;;  %s2841_s17 = smov [#allocation2]  }
  0x50   : > { %p2716_p0 = scmp.ne.s32.totalorder %s415_s8, %s2715_s11  ;;  %s2720_s28 = sshll.u32 %s2841_s17, 4  ;;  %s2721_s28 = int_to_ptr.vmem [resolvable:$false] %s2720_s28 }
  0x51   : > { %s2722_s18 = scalar_lea.vmem %s2721_s28, 256  ;;  %p2723_p2 = scmp.lt.s32.totalorder %s415_s8, %s2721_s28 }
  0x52   : > { %p2718_p5 = pnand %p2716_p0, %p2704_p6  ;;  %p2724_p4 = scmp.lt.s32.totalorder %s2722_s18, %s2715_s11 }
  0x54   : > { %p2719_p9 = pneg %p2718_p5  ;;  %p2725_p1 = por %p2724_p4, %p2723_p2 }
  0x56   : > { %p2726_p8 = pnand %p2725_p1, %p2719_p9 }
  0x58   : > { %2729 = shalt.err (!%p2726_p8)
}
  0x59   : > { %2536 = dma.hbm_to_vmem [thread:$0]  (!%p3033_p11), %s3031_s19, 128, %s415_s8, %s404_s13  }
  0x5a   : > { %s2287_s23 = sshll.u32 %s2834_s24, 4  ;;  %s424_s11 = scalar_lea.vmem [#allocation5], %s3024_s30 }
  0x5b   : > { %s3063_s17 = scalar_lea.hbm %s3414_s2, %s2287_s23  ;;  %s431_s28 = sshll.u32 %s424_s11, 4  ;;  %s432_s28 = int_to_ptr.vmem [resolvable:$true] %s431_s28 }
  0x5c   : > { %s3450_s14 = sand.u32 1, %s2834_s24   ;;  %s2730_s18 = scalar_lea.hbm %s3063_s17, 16 }
  0x5d   : > { %s422_s20 = scalar_lea.sflag [#allocation6], %s3450_s14  ;;  %p2731_p8 = scmp.ne.s32.totalorder %s3063_s17, %s2730_s18 }
  0x5e   : > { %s2735_s19 = scalar_lea.hbm %s3414_s2, 32  ;;  %p2736_p7 = scmp.lt.s32.totalorder %s3063_s17, %s3414_s2 }
  0x5f   : > { %p2733_p1 = pnand %p2731_p8, %p2704_p6  ;;  %p2737_p12 = scmp.lt.s32.totalorder %s2735_s19, %s2730_s18 }
  0x61   : > { %p2734_p3 = pneg %p2733_p1  ;;  %p2738_p10 = por %p2737_p12, %p2736_p7 }
  0x63   : > { %p2739_p13 = pnand %p2738_p10, %p2734_p3 }
  0x65   : > { %2742 = shalt.err (!%p2739_p13)
}
  0x66   : > { %s2743_s30 = scalar_lea.vmem %s432_s28, 16  ;;  %s2842_s15 = smov [#allocation5]  }
  0x67   : > { %p2744_p0 = scmp.ne.s32.totalorder %s432_s28, %s2743_s30  ;;  %s2748_s11 = sshll.u32 %s2842_s15, 4  ;;  %s2749_s11 = int_to_ptr.vmem [resolvable:$false] %s2748_s11 }
  0x68   : > { %s2750_s14 = scalar_lea.vmem %s2749_s11, 32  ;;  %p2751_p2 = scmp.lt.s32.totalorder %s432_s28, %s2749_s11 }
  0x69   : > { %p2746_p5 = pnand %p2744_p0, %p2704_p6  ;;  %p2752_p4 = scmp.lt.s32.totalorder %s2750_s14, %s2743_s30 }
  0x6b   : > { %p2747_p9 = pneg %p2746_p5  ;;  %p2753_p8 = por %p2752_p4, %p2751_p2 }
  0x6d   : > { %p2754_p1 = pnand %p2753_p8, %p2747_p9 }
  0x6f   : > { %2757 = shalt.err (!%p2754_p1)
}
  0x70   : > { %2539 = dma.hbm_to_vmem [thread:$0]  (!%p3033_p11), %s3063_s17, 16, %s432_s28, %s422_s20  }
  0x71   : > { %p3451_p3 = scmp.ne.s32.totalorder %s3440_s29, 0 }
  0x72   : > { %s3089_s18 = sand.u32 (!%p3451_p3), 1, %s2826_s22   ;;  %p3452_p6 = scmp.ne.s32.totalorder (!%p3451_p3), %s3437_s27, 0 }
  0x73   : > { %440 = sbr.rel (%p3451_p3) target bundleno = 1670 (0x686), region = 68  ;;  %s2289_s8 = sshll.u32 (!%p3451_p3), %s3089_s18, 3 }
  0x74   : > { %s443_s13 = scalar_lea.sflag (!%p3451_p3), [#allocation3], %s3089_s18  ;;  %s3095_s19 = scalar_lea.vmem (!%p3451_p3), [#allocation2], %s2289_s8 }
  0x78   : > { %2801 = dma.done.wait (%p3452_p6), %s443_s13, 128  }
  0x79   : > { %2803 = vsyncadd (%p3452_p6), %s443_s13, 4294967168  ;;  %s451_s9 = sand.u32 1, %s2939_s25   ;;  %s454_s17 = scalar_lea.vmem [#allocation5], %s3089_s18 }
  0x7a   : > { %s452_s29 = scalar_lea.sflag [#allocation6], %s451_s9 }
  0x7b   : > { %2805 = dma.done.wait (%p3452_p6), %s452_s29, 16  }
  0x7c   : > { %2807 = vsyncadd (%p3452_p6), %s452_s29, 4294967280  ;;  %p3453_p11 = scmp.eq.s32.totalorder %s2939_s25, 0 }
  0x7e   : > { %2809 = dma.done.wait (%p3453_p11), [#allocation6], 16   ;;  %p3454_p7 = pmov %p3453_p11 }
  0x80   : > { %2811 = vsyncadd (%p3454_p7), [#allocation6], 4294967280  ;;  %p3455_p12 = pmov %p3454_p7 }
  0x81   : > { %p3456_p10 = pmov %p3454_p7 }
  0x82   : > { %2813 = dma.done.wait (%p3455_p12), [#allocation9], 144  }
  0x83   : > { %2815 = vsyncadd (%p3456_p10), [#allocation9], 4294967152  ;;  %p515_p13 = scmp.lt.s32.totalorder %s2939_s25, 1  ;;  %vm520_vm0 = vcmask 261120   ;;  %v555_v7 = vld [vmem:[%s3417_s5 + $0x18] sm:$0xff]  ;;  %v2843_v8 = vmov 0.0  }
  0x84   : > { %2384 = vmatprep.subr.mxu1 %v2843_v8  ;;  %v554_v9 = vld [vmem:[%s3417_s5 + $0x10] sm:$0xff]  ;;  %vm2844_vm1 = vmmov 0   ;;  %2406 = vmatprep.subr.mxu0 %v2843_v8  ;;  %v553_v10 = vld [vmem:[%s3417_s5 + $0x8] sm:$0xff]  ;;  %v552_v11 = vld [vmem:[%s3417_s5] sm:$0xff]  ;;  %s2845_s13 = smov 112   ;;  %vm725_vm2 = vcmask 130048  }
  0x85   : > { %s516_s28 = scalar_select %p515_p13, %s2939_s25, 1  ;;  %2392 = vmatprep.mubr.msk.f32.mxu1 %vm2844_vm1, %v2843_v8  ;;  %2385 = vmatpush3.msra.mxu1 %v555_v7  ;;  %v2295_v16 = vld [vmem:[#allocation7] ss:$0 sm:$0xff]  ;;  %v2296_v18 = vld [vmem:[#allocation8] ss:$0 sm:$0xff]  ;;  %v633_v21 = vld [vmem:[%s3418_s6 + $0x18] sm:$0xff] }
  0x86   : > { %2386 = vmatprep.subr.mxu1 %v2843_v8  ;;  %2408 = vmatprep.mubr.msk.f32.mxu0 %vm2844_vm1, %v2843_v8  ;;  %v632_v22 = vld [vmem:[%s3418_s6 + $0x10] sm:$0xff]  ;;  %v631_v23 = vld [vmem:[%s3418_s6 + $0x8] sm:$0xff]  ;;  %v630_v24 = vld [vmem:[%s3418_s6] sm:$0xff]  ;;  %s2846_s9 = smov 96   ;;  %vm1333_vm3 = vcmask 64512   ;;  %vm1346_vm4 = vcmask 15360  }
  0x87   : > { %s2294_s20 = sshll.u32 %s516_s28, 3  ;;  %2387 = vmatpush3.msra.mxu1 %v554_v9  ;;  %v551_v25 = vld [vmem:[%s3095_s19] sm:$0xff]  ;;  %s2847_s19 = smov 80   ;;  %v723_v51 = vld [vmem:[%s3415_s3 + $0x10] sm:$0xff]  ;;  %v724_v62 = vld [vmem:[%s3415_s3 + $0x18] sm:$0xff]  ;;  %vm1422_vm5 = vcmask 1041408  }
  0x88   : > { %s518_s26 = scalar_lea.vmem %s3412_s0, %s2294_s20  ;;  %2388 = vmatprep.subr.mxu1 %v2843_v8  ;;  %v1033_v34 = vld [vmem:[%s3422_s10] sm:$0x3]  ;;  %v1035_v36 = vld [vmem:[%s3422_s10 + $0x4] sm:$0x3]  ;;  %v1034_v38 = vld [vmem:[%s3422_s10 + $0x2] sm:$0x3] }
  0x89   : > { %v519_v0 = vld [vmem:[%s518_s26] sm:$0xff]  ;;  %2389 = vmatpush3.msra.mxu1 %v553_v10  ;;  %v722_v48 = vld [vmem:[%s3415_s3 + $0x8] sm:$0xff]  ;;  %v1039_v10 = vld [vmem:[%s3416_s4 + $0x10] sm:$0xff]  ;;  %s2849_s29 = smov 16   ;;  %s2851_s28 = smov 48   ;;  %vm2050_vm6 = vcmask 392192  }
  0x8a   : > { %v521_v1 = vsel %vm520_vm0, %v519_v0, 0.0  ;;  %2390 = vmatprep.subr.mxu1 %v2843_v8  ;;  %v1036_v40 = vld [vmem:[%s3422_s10 + $0x6] sm:$0x3]  ;;  %v2307_v43 = vld [vmem:[%s454_s17] ss:$0 sm:$0xff]  ;;  %s2850_s17 = smov 32  }
  0x8b   : > { %522 = vadd.xlane.f32.xlu0 %v521_v1  ;;  %2391 = vmatpush3.msra.mxu1 %v552_v11  ;;  %v721_v41 = vld [vmem:[%s3415_s3] sm:$0xff]  ;;  %vm2060_vm7 = vcmask 523264   ;;  %s2330_s20 = sshll.u32 %s2939_s25, 7  ;;  %s514_s23 = scalar_lea.vmem [#allocation11], %s2289_s8 }
  0x8c   : > { %2395 = vmatprep.subr.mxu1 %v2843_v8  ;;  %v1037_v55 = vld [vmem:[%s3416_s4] sm:$0xff]  ;;  %s2149_s27 = sshll.u32 %s514_s23, 4  ;;  %s3368_s15 = scalar_lea.hbm %s3424_s12, %s2330_s20  ;;  %s3370_s27 = int_to_ptr.vmem [resolvable:$true] %s2149_s27 }
  0x8d   : > { %s2136_s11 = scalar_lea.sflag [#allocation4], %s3089_s18  ;;  %s2758_s14 = scalar_lea.vmem %s3370_s27, 128 }
  0x8e   : > { %p2759_p0 = scmp.ne.s32.totalorder %s3370_s27, %s2758_s14  ;;  %p3457_p5 = scmp.ne.s32.totalorder %s3448_s16, 0 }
  0x8f   : > { %s2852_s25 = smov [#allocation11]  }
  0x90   : > { %p2760_p9 = pnand %p2759_p0, %p3457_p5  ;;  %s2762_s8 = sshll.u32 %s2852_s25, 4  ;;  %s2763_s8 = int_to_ptr.vmem [resolvable:$false] %s2762_s8 }
  0x91   : > { %p2765_p4 = scmp.lt.s32.totalorder %s3370_s27, %s2763_s8 }
  0x92   : > { %p2761_p2 = pneg %p2760_p9 }
 0x114   : > { %v523_v2 = vpop.xlane.xlu0 %522 }
 0x115   : > { %v525_v3 = vmul.f32 0.03125, %v523_v2 }
 0x117   : > { %v526_v4 = vsub.f32 %v519_v0, %v525_v3 }
 0x119   : > { %v527_v5 = vmul.f32 %v526_v4, %v526_v4 }
 0x11b   : > { %v528_v6 = vsel %vm520_vm0, %v527_v5, 0.0 }
 0x11c   : > { %529 = vadd.xlane.f32.xlu0 %v528_v6  ;;  %v1038_v6 = vld [vmem:[%s3416_s4 + $0x8] sm:$0xff] }
 0x1a5   : > { %v530_v12 = vpop.xlane.xlu0 %529 }
 0x1a6   : > { %v531_v13 = vmul.f32 0.03125, %v530_v12 }
 0x1a8   : > { %v532_v14 = vadd.f32 1e-05, %v531_v13 }
 0x1aa   : > { %2598 = vrsqrt.f32 %v532_v14 }
 0x1b7   : > { %v2599_v15 = vpop.eup %2598 }
 0x1b8   : > { %v534_v17 = vmul.f32 %v2599_v15, %v526_v4 }
 0x1ba   : > { %v542_v19 = vmul.f32 %v2295_v16, %v534_v17  ;;  %v1040_v17 = vld [vmem:[%s3416_s4 + $0x18] sm:$0xff] }
 0x1bc   : > { %v550_v20 = vadd.f32 %v2296_v18, %v542_v19 }
 0x1be   : > { %2393 = vmatmul.mubr.msk.f32.vlgmr.msra.gmra.mxu1 %vm520_vm0, %v550_v20 }
 0x1bf   : > { %2396 = vmatpush3.msra.mxu1 %v633_v21  ;;  %2403 = vmatprep.mubr.msk.f32.mxu1 %vm2844_vm1, %v2843_v8 }
 0x1c0   : > { %2397 = vmatprep.subr.mxu1 %v2843_v8 }
 0x1c1   : > { %2398 = vmatpush3.msra.mxu1 %v632_v22 }
 0x1c2   : > { %2399 = vmatprep.subr.mxu1 %v2843_v8 }
 0x1c3   : > { %2400 = vmatpush3.msra.mxu1 %v631_v23  ;;  %v1415_v23 = vld [vmem:[#allocation10] sm:$0x3] }
 0x1c4   : > { %2401 = vmatprep.subr.mxu1 %v2843_v8 }
 0x1c5   : > { %2402 = vmatpush3.msra.mxu1 %v630_v24  ;;  %v1416_v24 = vld [vmem:[#allocation10 + $0x2] sm:$0x3] }
 0x1c6   : > { %2404 = vmatmul.mubr.msk.f32.vlgmr.msra.gmra.mxu1 %vm520_vm0, %v551_v25  ;;  %2411 = vmatprep.subr.mxu1 %v2843_v8 }
 0x1c7   : > { %2413 = vmatprep.mubr.msk.f32.mxu1 %vm2844_vm1, %v2843_v8 }
 0x27e   : > { %v625_v26 = vpop.f32.mrf.mxu1 }
 0x27f   : > { %v629_v27 = vmul.f32 0.25, %v625_v26 }
 0x280   : > { %v2394_v28 = vpop.f32.mrf.mxu1 }
 0x281   : > { %708 = vrot.lane.b32.xlu1 %v629_v27, %s2845_s13 }
 0x286   : > { %v3167_v29 = vpop.f32.mrf.mxu1 }
 0x287   : > { %717 = vrot.lane.b32.xlu0 %v3167_v29, %s2846_s9  ;;  %715 = vrot.lane.b32.xlu1 %v3167_v29, %s2845_s13  ;;  %s2848_s13 = smov 64  }
 0x288   : > { %2407 = vmatpush3.xpose.msk.msra.mxu0 %vm725_vm2, %v3167_v29  ;;  %v2405_v30 = vpop.f32.mrf.mxu1 }
 0x289   : > { %2416 = vmatprep.subr.mxu0 %v2843_v8 }
 0x28b   : > { %2409 = vmatmul.mubr.msk.f32.vlgmr.msra.gmra.mxu0 %vm725_vm2, %v629_v27  ;;  %710 = vrot.lane.b32.xlu1 %v629_v27, %s2846_s9 }
 0x28c   : > { %2418 = vmatprep.mubr.msk.f32.mxu0 %vm2844_vm1, %v2843_v8 }
 0x28f   : > { %719 = vrot.lane.b32.xlu1 %v3167_v29, %s2847_s19 }
 0x293   : > { %712 = vrot.lane.b32.xlu1 %v629_v27, %s2847_s19 }
 0x2f3   : > { %v709_v31 = vpop.permute.xlu1 %708 }
 0x2f9   : > { %v3178_v32 = vpop.permute.xlu0 %717  ;;  %v3180_v33 = vpop.permute.xlu1 %715 }
 0x2fa   : > { %2412 = vmatpush3.xpose.msk.msra.mxu1 %vm725_vm2, %v3180_v33  ;;  %2417 = vmatpush3.xpose.msk.msra.mxu0 %vm725_vm2, %v3178_v32 }
 0x2fb   : > { %2426 = vmatprep.subr.mxu0 %v2843_v8  ;;  %2421 = vmatprep.subr.mxu1 %v2843_v8 }
 0x2fd   : > { %2414 = vmatmul.mubr.msk.f32.vlgmr.msra.gmra.mxu1 %vm725_vm2, %v709_v31  ;;  %v711_v35 = vpop.permute.xlu1 %710 }
 0x2fe   : > { %2419 = vmatmul.mubr.msk.f32.vlgmr.msra.gmra.mxu0 %vm725_vm2, %v711_v35  ;;  %2423 = vmatprep.mubr.msk.f32.mxu1 %vm2844_vm1, %v2843_v8 }
 0x2ff   : > { %2427 = vmatpush3.xpose.msk.msra.mxu0 %vm725_vm2, %v1033_v34  ;;  %2428 = vmatprep.mubr.msk.f32.mxu0 %vm2844_vm1, %v2843_v8 }
 0x300   : > { %2436 = vmatprep.subr.mxu0 %v2843_v8 }
 0x301   : > { %v3202_v37 = vpop.permute.xlu1 %719 }
 0x302   : > { %2422 = vmatpush3.xpose.msk.msra.mxu1 %vm725_vm2, %v3202_v37  ;;  %2429 = vmatmul.mubr.msk.f32.vlgmr.msra.gmra.mxu0 %vm725_vm2, %v629_v27 }
 0x303   : > { %2437 = vmatpush3.xpose.msk.msra.mxu0 %vm725_vm2, %v1035_v36  ;;  %2431 = vmatprep.subr.mxu1 %v2843_v8 }
 0x304   : > { %2438 = vmatprep.mubr.msk.f32.mxu0 %vm2844_vm1, %v2843_v8  ;;  %2446 = vmatprep.subr.mxu0 %v2843_v8 }
 0x305   : > { %v713_v39 = vpop.permute.xlu1 %712 }
 0x306   : > { %2424 = vmatmul.mubr.msk.f32.vlgmr.msra.gmra.mxu1 %vm725_vm2, %v713_v39  ;;  %2439 = vmatmul.mubr.msk.f32.vlgmr.msra.gmra.mxu0 %vm725_vm2, %v711_v35 }
 0x307   : > { %2432 = vmatpush3.xpose.msk.msra.mxu1 %vm725_vm2, %v1034_v38  ;;  %2433 = vmatprep.mubr.msk.f32.mxu1 %vm2844_vm1, %v2843_v8 }
 0x308   : > { %2441 = vmatprep.subr.mxu1 %v2843_v8  ;;  %2448 = vmatprep.mubr.msk.f32.mxu0 %vm2844_vm1, %v2843_v8 }
 0x309   : > { %2447 = vmatpush3.msk.msra.mxu0 %vm1422_vm5, %v1415_v23 }
 0x30a   : > { %2434 = vmatmul.mubr.msk.f32.vlgmr.msra.gmra.mxu1 %vm725_vm2, %v709_v31  ;;  %2456 = vmatprep.subr.mxu0 %v2843_v8 }
 0x30b   : > { %2442 = vmatpush3.xpose.msk.msra.mxu1 %vm725_vm2, %v1036_v40  ;;  %2443 = vmatprep.mubr.msk.f32.mxu1 %vm2844_vm1, %v2843_v8 }
 0x30c   : > { %2451 = vmatprep.subr.mxu1 %v2843_v8 }
 0x30e   : > { %2444 = vmatmul.mubr.msk.f32.vlgmr.msra.gmra.mxu1 %vm725_vm2, %v713_v39 }
 0x30f   : > { %2453 = vmatprep.mubr.msk.f32.mxu1 %vm2844_vm1, %v2843_v8  ;;  %2452 = vmatpush3.msk.msra.mxu1 %vm1422_vm5, %v1416_v24 }
 0x310   : > { %2461 = vmatprep.subr.mxu1 %v2843_v8 }
 0x34b   : > { %v796_v42 = vpop.f32.mrf.mxu0 }
 0x34c   : > { %v797_v44 = vadd.f32 %v796_v42, %v721_v41 }
 0x34d   : > { %v2410_v45 = vpop.f32.mrf.mxu0 }
 0x34e   : > { %v3239_v46 = vadd.f32 %v2307_v43, %v797_v44 }
 0x350   : > { %v1334_v47 = vsel %vm1333_vm3, %v3239_v46, -inf }
 0x351   : > { %1335 = vmax.xlane.f32.xlu1 %v1334_v47 }
 0x3bd   : > { %v870_v49 = vpop.f32.mrf.mxu1 }
 0x3be   : > { %v871_v50 = vadd.f32 %v870_v49, %v722_v48  ;;  %v944_v52 = vpop.f32.mrf.mxu0 }
 0x3bf   : > { %v2415_v53 = vpop.f32.mrf.mxu1  ;;  %v945_v57 = vadd.f32 %v944_v52, %v723_v51  ;;  %v1417_v52 = vld [vmem:[#allocation10 + $0x4] sm:$0x3] }
 0x3c0   : > { %v2420_v54 = vpop.f32.mrf.mxu0  ;;  %v3252_v56 = vadd.f32 %v2307_v43, %v871_v50 }
 0x3c1   : > { %v3260_v0 = vadd.f32 %v2307_v43, %v945_v57 }
 0x3c2   : > { %v1110_v58 = vpop.f32.mrf.mxu0  ;;  %v1337_v59 = vsel %vm1333_vm3, %v3252_v56, -inf }
 0x3c3   : > { %v1111_v60 = vadd.f32 %v1110_v58, %v1037_v55  ;;  %1338 = vmax.xlane.f32.xlu1 %v1337_v59  ;;  %v1340_v7 = vsel %vm1333_vm3, %v3260_v0, -inf }
 0x3c4   : > { %v2430_v61 = vpop.f32.mrf.mxu0 }
 0x3c5   : > { %v1347_v63 = vsel %vm1346_vm4, %v1111_v60, -inf }
 0x3c6   : > { %1348 = vmax.xlane.f32.xlu0 %v1347_v63  ;;  %v1018_v1 = vpop.f32.mrf.mxu1  ;;  %v1256_v2 = vpop.f32.mrf.mxu0 }
 0x3c7   : > { %v1019_v3 = vadd.f32 %v1018_v1, %v724_v62  ;;  %v1257_v14 = vadd.f32 %v1256_v2, %v1039_v10 }
 0x3c8   : > { %v2425_v4 = vpop.f32.mrf.mxu1  ;;  %v2440_v5 = vpop.f32.mrf.mxu0 }
 0x3c9   : > { %v3267_v9 = vadd.f32 %v2307_v43, %v1019_v3  ;;  %v1353_v21 = vsel %vm1346_vm4, %v1257_v14, -inf }
 0x3ca   : > { %1341 = vmax.xlane.f32.xlu0 %v1340_v7  ;;  %v1183_v11 = vpop.f32.mrf.mxu1 }
 0x3cb   : > { %v1184_v12 = vadd.f32 %v1183_v11, %v1038_v6  ;;  %v1343_v15 = vsel %vm1333_vm3, %v3267_v9, -inf }
 0x3cc   : > { %v2435_v13 = vpop.f32.mrf.mxu1 }
 0x3cd   : > { %v1350_v16 = vsel %vm1346_vm4, %v1184_v12, -inf  ;;  %v2058_v13 = vld [vmem:[%s3419_s7 + $0x30] sm:$0xff] }
 0x3ce   : > { %1344 = vmax.xlane.f32.xlu0 %v1343_v15  ;;  %1351 = vmax.xlane.f32.xlu1 %v1350_v16  ;;  %v1329_v18 = vpop.f32.mrf.mxu1  ;;  %v2056_v15 = vld [vmem:[%s3419_s7 + $0x20] sm:$0xff]  ;;  %v2055_v16 = vld [vmem:[%s3419_s7 + $0x18] sm:$0xff] }
 0x3cf   : > { %v1330_v20 = vadd.f32 %v1329_v18, %v1040_v17 }
 0x3d0   : > { %v2445_v19 = vpop.f32.mrf.mxu1 }
 0x3d1   : > { %v1356_v22 = vsel %vm1346_vm4, %v1330_v20, -inf }
 0x3d2   : > { %1354 = vmax.xlane.f32.xlu1 %v1353_v21 }
 0x3d6   : > { %1357 = vmax.xlane.f32.xlu1 %v1356_v22 }
 0x3da   : > { %v1336_v25 = vpop.xlane.xlu1 %1335 }
 0x3e4   : > { %1724 = vrot.lane.b32.xlu0 %v3167_v29, %s2848_s13 }
 0x3e7   : > { %1800 = vrot.lane.b32.xlu1 %v3180_v33, %s2848_s13 }
 0x3e8   : > { %1952 = vrot.lane.b32.xlu0 %v3202_v37, %s2848_s13 }
 0x3eb   : > { %1876 = vrot.lane.b32.xlu1 %v3178_v32, %s2848_s13  ;;  %s2764_s13 = scalar_lea.vmem %s2763_s8, 256 }
 0x3ec   : > { %p2766_p8 = scmp.lt.s32.totalorder %s2764_s13, %s2758_s14 }
 0x3ee   : > { %p2767_p1 = por %p2766_p8, %p2765_p4 }
 0x3f0   : > { %p2768_p3 = pnand %p2767_p1, %p2761_p2 }
 0x44c   : > { %v1339_v29 = vpop.xlane.xlu1 %1338 }
 0x44f   : > { %v1349_v26 = vpop.xlane.xlu0 %1348 }
 0x450   : > { %v1359_v27 = vmax.f32 %v1336_v25, %v1349_v26 }
 0x452   : > { %v1375_v28 = vsub.f32 %v1111_v60, %v1359_v27  ;;  %v1363_v41 = vsub.f32 %v3239_v46, %v1359_v27 }
 0x453   : > { %v1342_v35 = vpop.xlane.xlu0 %1341 }
 0x454   : > { %v1379_v30 = vmul.f32 1.442695, %v1375_v28  ;;  %v1367_v49 = vmul.f32 1.442695, %v1363_v41 }
 0x456   : > { %2600 = vpow2.f32 %v1379_v30 }
 0x457   : > { %v1352_v31 = vpop.xlane.xlu1 %1351  ;;  %v1345_v43 = vpop.xlane.xlu0 %1344 }
 0x458   : > { %v1360_v34 = vmax.f32 %v1339_v29, %v1352_v31  ;;  %v2054_v31 = vld [vmem:[%s3419_s7 + $0x10] sm:$0xff] }
 0x45a   : > { %v1364_v33 = vsub.f32 %v3252_v56, %v1360_v34  ;;  %v1376_v36 = vsub.f32 %v1184_v12, %v1360_v34  ;;  %v1418_v56 = vld [vmem:[#allocation10 + $0x6] sm:$0x3]  ;;  %v2053_v34 = vld [vmem:[%s3419_s7 + $0x8] sm:$0xff] }
 0x45b   : > { %v1355_v37 = vpop.xlane.xlu1 %1354  ;;  %v2059_v12 = vld [vmem:[%s3419_s7 + $0x38] sm:$0xff] }
 0x45c   : > { %v1369_v38 = vmul.f32 1.442695, %v1364_v33  ;;  %v1381_v39 = vmul.f32 1.442695, %v1376_v36  ;;  %v1361_v40 = vmax.f32 %v1342_v35, %v1355_v37  ;;  %v2052_v37 = vld [vmem:[%s3419_s7] sm:$0xff] }
 0x45e   : > { %2602 = vpow2.f32 %v1369_v38  ;;  %v1365_v32 = vsub.f32 %v3260_v0, %v1361_v40  ;;  %v1377_v42 = vsub.f32 %v1257_v14, %v1361_v40  ;;  %v1725_v0 = vpop.permute.xlu0 %1724  ;;  %v2057_v14 = vld [vmem:[%s3419_s7 + $0x28] sm:$0xff] }
 0x45f   : > { %2604 = vpow2.f32 %v1381_v39  ;;  %v1358_v44 = vpop.xlane.xlu1 %1357 }
 0x460   : > { %v1371_v45 = vmul.f32 1.442695, %v1365_v32  ;;  %v1383_v47 = vmul.f32 1.442695, %v1377_v42  ;;  %v1362_v48 = vmax.f32 %v1345_v43, %v1358_v44 }
 0x462   : > { %2606 = vpow2.f32 %v1371_v45  ;;  %v1366_v50 = vsub.f32 %v3267_v9, %v1362_v48  ;;  %v1378_v51 = vsub.f32 %v1330_v20, %v1362_v48  ;;  %v1953_v9 = vpop.permute.xlu0 %1952 }
 0x463   : > { %2608 = vpow2.f32 %v1383_v47  ;;  %v2601_v53 = vpop.eup %2600  ;;  %v1801_v61 = vpop.permute.xlu1 %1800 }
 0x464   : > { %v1373_v54 = vmul.f32 1.442695, %v1366_v50  ;;  %v1385_v46 = vmul.f32 1.442695, %v1378_v51  ;;  %2610 = vpow2.f32 %v1367_v49  ;;  %2449 = vmatmul.mubr.msk.f32.vlgmr.msra.gmra.mxu0 %vm1346_vm4, %v2601_v53  ;;  %v1399_v10 = vsel %vm1346_vm4, %v2601_v53, 0.0 }
 0x465   : > { %2457 = vmatpush3.msk.msra.mxu0 %vm1422_vm5, %v1417_v52  ;;  %2458 = vmatprep.mubr.msk.f32.mxu0 %vm2844_vm1, %v2843_v8 }
 0x466   : > { %2612 = vpow2.f32 %v1373_v54  ;;  %2466 = vmatprep.subr.mxu0 %v2843_v8 }
 0x467   : > { %2614 = vpow2.f32 %v1385_v46  ;;  %v1877_v6 = vpop.permute.xlu1 %1876 }
 0x46b   : > { %v2603_v55 = vpop.eup %2602 }
 0x46c   : > { %v2605_v57 = vpop.eup %2604  ;;  %v1390_v58 = vsel %vm1333_vm3, %v2603_v55, 0.0 }
 0x46d   : > { %2454 = vmatmul.mubr.msk.f32.vlgmr.msra.gmra.mxu1 %vm1346_vm4, %v2605_v57  ;;  %v1402_v59 = vsel %vm1346_vm4, %v2605_v57, 0.0  ;;  %1391 = vadd.xlane.f32.xlu1 %v1390_v58 }
 0x46e   : > { %1403 = vadd.xlane.f32.xlu0 %v1402_v59  ;;  %2462 = vmatpush3.msk.msra.mxu1 %vm1422_vm5, %v1418_v56 }
 0x46f   : > { %v2607_v60 = vpop.eup %2606  ;;  %2463 = vmatprep.mubr.msk.f32.mxu1 %vm2844_vm1, %v2843_v8  ;;  %2471 = vmatprep.subr.mxu1 %v2843_v8 }
 0x470   : > { %v2609_v62 = vpop.eup %2608  ;;  %v1393_v63 = vsel %vm1333_vm3, %v2607_v60, 0.0 }
 0x471   : > { %2459 = vmatmul.mubr.msk.f32.vlgmr.msra.gmra.mxu0 %vm1346_vm4, %v2609_v62  ;;  %v1405_v1 = vsel %vm1346_vm4, %v2609_v62, 0.0  ;;  %v2611_v2 = vpop.eup %2610 }
 0x472   : > { %2467 = vmatpush3.msra.mxu0 %v1725_v0  ;;  %1394 = vadd.xlane.f32.xlu0 %v1393_v63  ;;  %v1387_v11 = vsel %vm1333_vm3, %v2611_v2, 0.0 }
 0x473   : > { %v2613_v3 = vpop.eup %2612  ;;  %1406 = vadd.xlane.f32.xlu1 %v1405_v1  ;;  %2468 = vmatprep.mubr.msk.f32.mxu0 %vm2844_vm1, %v2843_v8 }
 0x474   : > { %v2615_v4 = vpop.eup %2614  ;;  %2476 = vmatprep.subr.mxu0 %v2843_v8  ;;  %v1396_v5 = vsel %vm1333_vm3, %v2613_v3, 0.0 }
 0x475   : > { %2464 = vmatmul.mubr.msk.f32.vlgmr.msra.gmra.mxu1 %vm1346_vm4, %v2615_v4  ;;  %2469 = vmatmul.mubr.msk.f32.vlgmr.msra.gmra.mxu0 %vm1333_vm3, %v2611_v2  ;;  %v1408_v7 = vsel %vm1346_vm4, %v2615_v4, 0.0 }
 0x476   : > { %2472 = vmatpush3.msra.mxu1 %v1801_v61  ;;  %2477 = vmatpush3.msra.mxu0 %v1877_v6 }
 0x477   : > { %1409 = vadd.xlane.f32.xlu1 %v1408_v7  ;;  %1397 = vadd.xlane.f32.xlu0 %v1396_v5 }
 0x478   : > { %2473 = vmatprep.mubr.msk.f32.mxu1 %vm2844_vm1, %v2843_v8  ;;  %2478 = vmatprep.mubr.msk.f32.mxu0 %vm2844_vm1, %v2843_v8 }
 0x479   : > { %2481 = vmatprep.subr.mxu1 %v2843_v8  ;;  %2474 = vmatmul.mubr.msk.f32.vlgmr.msra.gmra.mxu1 %vm1333_vm3, %v2603_v55 }
 0x47a   : > { %2479 = vmatmul.mubr.msk.f32.vlgmr.msra.gmra.mxu0 %vm1333_vm3, %v2607_v60  ;;  %2482 = vmatpush3.msra.mxu1 %v1953_v9 }
 0x47b   : > { %1400 = vadd.xlane.f32.xlu1 %v1399_v10  ;;  %1388 = vadd.xlane.f32.xlu0 %v1387_v11 }
 0x47c   : > { %2483 = vmatprep.mubr.msk.f32.mxu1 %vm2844_vm1, %v2843_v8  ;;  %2486 = vmatprep.subr.mxu0 %v2843_v8 }
 0x47d   : > { %2484 = vmatmul.mubr.msk.f32.vlgmr.msra.gmra.mxu1 %vm1333_vm3, %v2613_v3  ;;  %2502 = vmatprep.mubr.msk.f32.mxu0 %vm2844_vm1, %v2843_v8 }
 0x47e   : > { %2487 = vmatpush3.msra.mxu0 %v2059_v12 }
 0x47f   : > { %2488 = vmatprep.subr.mxu0 %v2843_v8 }
 0x480   : > { %2489 = vmatpush3.msra.mxu0 %v2058_v13 }
 0x481   : > { %2490 = vmatprep.subr.mxu0 %v2843_v8 }
 0x482   : > { %2491 = vmatpush3.msra.mxu0 %v2057_v14 }
 0x483   : > { %2492 = vmatprep.subr.mxu0 %v2843_v8 }
 0x484   : > { %2493 = vmatpush3.msra.mxu0 %v2056_v15 }
 0x485   : > { %2494 = vmatprep.subr.mxu0 %v2843_v8 }
 0x486   : > { %2495 = vmatpush3.msra.mxu0 %v2055_v16 }
 0x487   : > { %2496 = vmatprep.subr.mxu0 %v2843_v8 }
 0x488   : > { %2497 = vmatpush3.msra.mxu0 %v2054_v31 }
 0x489   : > { %2498 = vmatprep.subr.mxu0 %v2843_v8 }
 0x48a   : > { %2499 = vmatpush3.msra.mxu0 %v2053_v34 }
 0x48b   : > { %2500 = vmatprep.subr.mxu0 %v2843_v8 }
 0x48c   : > { %2501 = vmatpush3.msra.mxu0 %v2052_v37 }
 0x4f6   : > { %v1392_v18 = vpop.xlane.xlu1 %1391 }
 0x4f7   : > { %v1404_v17 = vpop.xlane.xlu0 %1403 }
 0x4f8   : > { %v1412_v23 = vadd.f32 %v1404_v17, %v1392_v18 }
 0x4fa   : > { %2616 = vrcp.f32 %v1412_v23 }
 0x4fb   : > { %v1395_v19 = vpop.xlane.xlu0 %1394 }
 0x4fc   : > { %v1407_v20 = vpop.xlane.xlu1 %1406 }
 0x4fd   : > { %v1413_v24 = vadd.f32 %v1407_v20, %v1395_v19 }
 0x4ff   : > { %2618 = vrcp.f32 %v1413_v24 }
 0x500   : > { %v1398_v25 = vpop.xlane.xlu0 %1397  ;;  %v1410_v26 = vpop.xlane.xlu1 %1409 }
 0x501   : > { %v1414_v28 = vadd.f32 %v1410_v26, %v1398_v25 }
 0x503   : > { %2620 = vrcp.f32 %v1414_v28 }
 0x504   : > { %v1389_v46 = vpop.xlane.xlu0 %1388  ;;  %v1401_v55 = vpop.xlane.xlu1 %1400 }
 0x505   : > { %v1411_v56 = vadd.f32 %v1401_v55, %v1389_v46 }
 0x507   : > { %v2617_v43 = vpop.eup %2616  ;;  %2622 = vrcp.f32 %v1411_v56 }
 0x50c   : > { %v2619_v47 = vpop.eup %2618 }
 0x510   : > { %v2621_v52 = vpop.eup %2620 }
 0x514   : > { %v2623_v57 = vpop.eup %2622 }
 0x524   : > { %v1492_v21 = vpop.f32.mrf.mxu0 }
 0x526   : > { %v2450_v22 = vpop.f32.mrf.mxu0 }
 0x52d   : > { %v1568_v27 = vpop.f32.mrf.mxu1 }
 0x52f   : > { %v2455_v29 = vpop.f32.mrf.mxu1 }
 0x531   : > { %v1644_v30 = vpop.f32.mrf.mxu0 }
 0x533   : > { %v2460_v35 = vpop.f32.mrf.mxu0 }
 0x535   : > { %v1720_v33 = vpop.f32.mrf.mxu1  ;;  %v1796_v36 = vpop.f32.mrf.mxu0 }
 0x536   : > { %v1797_v38 = vadd.f32 %v1796_v36, %v1492_v21 }
 0x537   : > { %v2465_v39 = vpop.f32.mrf.mxu1  ;;  %v2470_v40 = vpop.f32.mrf.mxu0 }
 0x538   : > { %v2029_v58 = vmul.f32 %v2623_v57, %v1797_v38 }
 0x539   : > { %v1872_v41 = vpop.f32.mrf.mxu1 }
 0x53a   : > { %v1873_v32 = vadd.f32 %v1872_v41, %v1568_v27  ;;  %v1948_v42 = vpop.f32.mrf.mxu0 }
 0x53b   : > { %v1949_v44 = vadd.f32 %v1948_v42, %v1644_v30  ;;  %v2475_v45 = vpop.f32.mrf.mxu1 }
 0x53c   : > { %v2031_v48 = vmul.f32 %v2617_v43, %v1873_v32  ;;  %v2480_v49 = vpop.f32.mrf.mxu0 }
 0x53d   : > { %v2033_v50 = vmul.f32 %v2619_v47, %v1949_v44  ;;  %v2024_v51 = vpop.f32.mrf.mxu1 }
 0x53e   : > { %v2025_v8 = vadd.f32 %v2024_v51, %v1720_v33  ;;  %2037 = vrot.lane.b32.xlu0 %v2031_v48, %s2849_s29 }
 0x53f   : > { %2041 = vrot.lane.b32.xlu1 %v2033_v50, %s2850_s17  ;;  %v2485_v53 = vpop.f32.mrf.mxu1 }
 0x540   : > { %v2035_v54 = vmul.f32 %v2621_v52, %v2025_v8 }
 0x543   : > { %2045 = vrot.lane.b32.xlu1 %v2035_v54, %s2851_s28 }
 0x5b0   : > { %v2038_v59 = vpop.permute.xlu0 %2037 }
 0x5b1   : > { %v2042_v60 = vpop.permute.xlu1 %2041  ;;  %v2048_v61 = vsel %vm725_vm2, %v2029_v58, %v2038_v59 }
 0x5b2   : > { %v2049_v62 = vsel %vm520_vm0, %v2048_v61, %v2042_v60 }
 0x5b5   : > { %v2046_v63 = vpop.permute.xlu1 %2045 }
 0x5b6   : > { %v2051_v0 = vsel %vm2050_vm6, %v2049_v62, %v2046_v63 }
 0x5b7   : > { %2503 = vmatmul.mubr.msk.f32.vlgmr.msra.gmra.mxu0 %vm2060_vm7, %v2051_v0 }
 0x677   : > { %v2130_v1 = vpop.f32.mrf.mxu0 }
 0x678   : > { %2134 = vst.msk [vmem:[%s514_s23] sm:$0xff] %vm520_vm0, %v2130_v1 }
 0x679   : > { %v2504_v2 = vpop.f32.mrf.mxu0 }
 0x67a   : > { %2771 = shalt.err (!%p2768_p3)
}
 0x67b   : > { %s2772_s9 = scalar_lea.hbm %s3368_s15, 128  ;;  %s2776_s29 = scalar_lea.hbm %s3424_s12, 256 }
 0x67c   : > { %p2773_p6 = scmp.ne.s32.totalorder %s3368_s15, %s2772_s9  ;;  %p2777_p12 = scmp.lt.s32.totalorder %s3368_s15, %s3424_s12 }
 0x67d   : > { %p2778_p10 = scmp.lt.s32.totalorder %s2776_s29, %s2772_s9 }
 0x67e   : > { %p2774_p11 = pnand %p2773_p6, %p3457_p5 }
 0x67f   : > { %p2779_p13 = por %p2778_p10, %p2777_p12 }
 0x680   : > { %p2775_p7 = pneg %p2774_p11 }
 0x682   : > { %p2780_p0 = pnand %p2779_p13, %p2775_p7 }
 0x684   : > { %2783 = shalt.err (!%p2780_p0)
}
 0x685   : > { %2521 = dma.vmem_to_hbm [thread:$0]  (%p3457_p5), %s3370_s27, 128, %s3368_s15, %s2136_s11  }
 0x686 PF: > { %s3458_s20 = sld [smem:[#allocation18_spill]]  ;;  %s2161_s23 = sand.u32 1, %s2822_s21  }
 0x687   : > { %p3460_p2 = scmp.ge.s32.totalorder %s2834_s24, 2  ;;  %s2162_s26 = scalar_lea.sflag [#allocation4], %s2161_s23 }
 0x68c   : > { %p3459_p9 = scmp.ne.s32.totalorder %s3458_s20, 0 }
 0x68e   : > { %p2541_p4 = pnand %p3460_p2, %p3459_p9 }
 0x690   : > { %p2542_p8 = pneg %p2541_p4 }
 0x692   : > { %2817 = dma.done.wait (%p2542_p8), %s2162_s26, 128  }
 0x693   : > { %2819 = vsyncadd (%p2542_p8), %s2162_s26, 4294967168  ;;  %s3461_s24 = sld [smem:[#allocation19_spill]]  ;;  %s3464_s21 = smov %s2826_s22 }
 0x694   : > { %s3462_s30 = sld [smem:[#allocation17_spill]] }
 0x695   : > { %s3463_s23 = sld [smem:[#allocation20_spill]] }
 0x699   : > { %p29_p1 = scmp.ge.s32.totalorder %s3461_s24, 4  }
 0x69a   : > { %s3465_s22 = smov %s3462_s30 }
 0x69b   :  { %31 = sbr.rel (!%p29_p1) target bundleno = 12 (0xc), region = 141 }
 0x6a0   :  { %2167 = vsyncpa [#allocation3], 1 }
 0x6a1   :  { %2169 = vsyncpa [#allocation3 + $0x1], 1 }
 0x6a2   :  { %2170 = vsyncpa [#allocation6], 1 }
 0x6a3   :  { %2172 = vsyncpa [#allocation6 + $0x1], 1 }
 0x6a4   :  { %2173 = vsyncpa [#allocation9], 1 }
 0x6a5   :  { %2174 = vsyncpa [#allocation4], 1 }
 0x6a6   :  { %2176 = vsyncpa [#allocation4 + $0x1], 1 }

</bundles_post_ra>
